<compile_context>
chip_gen: v7x
topology: tpu7x:2x2x1
jax: 0.10.0
libtpu: 0.0.40
codegen_flags: <defaults>
</compile_context>

<pallas_src>
import numpy as np

import jax
import jax.numpy as jnp
from jax import lax
from jax.experimental import pallas as pl
from jax.experimental.pallas import tpu as pltpu


def _deconv_relu6_kernel(x_ref, w_ref, b_ref, o_ref):
    # x_ref: (tm, Kpad)   bf16 im2col band rows (zero-padded K tail)
    # w_ref: (Kpad, Nn)   bf16 block-Toeplitz weight (zero rows in the K pad)
    # b_ref: (1, Nn)      f32 bias tiled over (row-phase, ow)
    # o_ref: (tm, Nn)     phase-major output rows (lane-dense, unmasked vst)
    acc = jnp.dot(x_ref[...], w_ref[...], preferred_element_type=jnp.float32)
    o_ref[...] = jnp.clip(acc + b_ref[...], 0.0, 6.0).astype(o_ref.dtype)


def make_plan(Cin, Cout, H, W, kH, kW, stride, padding, output_padding):
    """Static geometry + block-Toeplitz selector (pure numpy, trace-free)."""
    s, p, op = stride, padding, output_padding
    OH = (H - 1) * s - 2 * p + kH + op
    OW = (W - 1) * s - 2 * p + kW + op
    # TODO(synk): OH/OW not divisible by stride (uneven phase counts), groups
    #             and dilation are not implemented.
    assert OH % s == 0 and OW % s == 0
    OHs, OWs = OH // s, OW // s
    pt, plft = kH - 1 - p, kW - 1 - p

    def taps(ph, k, off):
        out = []
        for a in range(k):
            if (ph + a - off) % s == 0:
                out.append((a, (ph + a - off) // s))   # (flipped tap, input offset)
        return out

    row_taps = [taps(ph, kH, pt) for ph in range(s)]
    col_taps = [taps(pw, kW, plft) for pw in range(s)]
    all_dh = [d for t in row_taps for (_, d) in t]
    all_dw = [d for t in col_taps for (_, d) in t]
    padT = max(0, -min(all_dh))
    padB = max(0, (OHs - 1) + max(all_dh) - (H - 1))
    padL = max(0, -min(all_dw))
    padR = max(0, (OWs - 1) + max(all_dw) - (W - 1))
    Hp, Wp = H + padT + padB, W + padL + padR
    D = sorted({d + padT for d in all_dh})      # distinct padded row offsets
    nD = len(D)
    K = nD * Wp * Cin
    Kpad = ((K + 127) // 128) * 128             # lane-dense contraction dim
    Nn = s * OW * Cout                          # lane-dense output width

    # selector: (row band, padded col, out row-phase, out col) -> flipped tap id
    ZERO = kH * kW
    S = np.full((nD, Wp, s, OW), ZERO, np.int32)
    for ph in range(s):
        for (a, dh) in row_taps[ph]:
            di = D.index(dh + padT)
            for ow in range(OW):
                pw, c = ow % s, ow // s
                for (b, dw) in col_taps[pw]:
                    S[di, c + dw + padL, ph, ow] = a * kW + b

    return dict(Cin=Cin, Cout=Cout, H=H, W=W, kH=kH, kW=kW, s=s,
                OH=OH, OW=OW, OHs=OHs, OWs=OWs,
                padT=padT, padB=padB, padL=padL, padR=padR,
                Hp=Hp, Wp=Wp, D=tuple(D), nD=nD,
                K=K, Kpad=Kpad, Nn=Nn, S=S)


def pack_weights(weight, bias, plan):
    """One-time weight/bias repack -> (Wbig (Kpad,Nn) bf16, bias row (1,Nn) f32).

    Deliberately off the hot path: call once per weight and cache the result.
    weight: (Cin, Cout, kH, kW) PyTorch ConvTranspose2d layout; bias: (Cout,).
    """
    Cin, Cout = plan["Cin"], plan["Cout"]
    kH, kW = plan["kH"], plan["kW"]
    K, Kpad, Nn = plan["K"], plan["Kpad"], plan["Nn"]
    S = plan["S"]
    Wf = jnp.transpose(jnp.flip(weight, (2, 3)), (2, 3, 0, 1)).reshape(kH * kW, Cin, Cout)
    Wfe = jnp.concatenate([Wf, jnp.zeros((1, Cin, Cout), Wf.dtype)], axis=0)
    Wbig = Wfe[S]                                             # (nD,Wp,s,OW,Cin,Cout)
    Wbig = jnp.transpose(Wbig, (0, 1, 4, 2, 3, 5)).reshape(K, Nn)
    Wbig = jnp.pad(Wbig, ((0, Kpad - K), (0, 0))).astype(jnp.bfloat16)
    # TODO(synk): at realistic image widths this O(W^2), ~22%-dense slab must be
    #             tiled over OW column blocks (matching x column windows) before
    #             it exceeds v7x's 64 MiB VMEM; also set vmem_limit_bytes then.
    b_row = jnp.tile(bias.astype(jnp.float32), plan["s"] * plan["OW"]).reshape(1, Nn)
    return Wbig, b_row


def conv_transpose_relu6_2d_nhwc(x_nhwc, w_packed, b_row, plan, out_dtype=jnp.float32):
    """NHWC core: (N, H, W, Cin) -> (N, OH, OW, Cout).  Keep NHWC end-to-end
    if the consumer allows (avoids the NCHW transposes entirely)."""
    N = x_nhwc.shape[0]
    OHs, OW, Cout, s = plan["OHs"], plan["OW"], plan["Cout"], plan["s"]
    K, Kpad, Nn = plan["K"], plan["Kpad"], plan["Nn"]
    D = plan["D"]

    # ---- im2col band build (wrapper-side; kernel sees contiguous (tm,Kpad) rows) ----
    x_pad = jnp.pad(x_nhwc, ((0, 0), (plan["padT"], plan["padB"]),
                             (plan["padL"], plan["padR"]), (0, 0)))
    band = jnp.stack([x_pad[:, d:d + OHs] for d in D], axis=2)   # (N,OHs,nD,Wp,Cin)
    M = N * OHs
    band = band.reshape(M, K)

    # M tiles: multiples of 8 rows, >=2 grid steps when M allows (v7x dual TC),
    # capped at 256 rows/tile for realistic sizes.
    tm = min(256, max(8, 8 * ((M + 15) // 16)))
    Mpad = ((M + tm - 1) // tm) * tm
    band = jnp.pad(band, ((0, Mpad - M), (0, Kpad - K))).astype(jnp.bfloat16)

    out_blk = pl.pallas_call(
        _deconv_relu6_kernel,
        out_shape=jax.ShapeDtypeStruct((Mpad, Nn), out_dtype),
        grid=(Mpad // tm,),
        in_specs=[
            pl.BlockSpec((tm, Kpad), lambda m: (m, 0)),
            pl.BlockSpec((Kpad, Nn), lambda m: (0, 0)),
            pl.BlockSpec((1, Nn), lambda m: (0, 0)),
        ],
        out_specs=pl.BlockSpec((tm, Nn), lambda m: (m, 0)),
        compiler_params=pltpu.CompilerParams(
            dimension_semantics=("parallel",)),
    )(band, w_packed, b_row)

    # de-interleave row phases: (M, s*OW*Cout) -> (N, OH, OW, Cout); reshape is free.
    out = out_blk[:M].reshape(N, OHs, s, OW, Cout).reshape(N, plan["OH"], OW, Cout)
    return out


def conv_transpose_relu6_2d(x, w_packed, b_row, plan, out_dtype=jnp.float32):
    """NCHW wrapper matching ConvTransposeReLU62d.forward (NCHW in / NCHW out)."""
    x_nhwc = jnp.transpose(x, (0, 2, 3, 1))
    out = conv_transpose_relu6_2d_nhwc(x_nhwc, w_packed, b_row, plan, out_dtype)
    return jnp.transpose(out, (0, 3, 1, 2))


def _reference(x, weight, bias, *, stride, padding, output_padding):
    """Pure-JAX reference matching PyTorch ConvTranspose2d + ReLU6 (NCHW).

    Uses the same bf16 rounding of x / weight as the kernel so only
    accumulation-order differences remain.
    """
    x = x.astype(jnp.bfloat16).astype(jnp.float32)
    weight = weight.astype(jnp.bfloat16).astype(jnp.float32)
    _, Cout, kH, kW = weight.shape
    s, p, op = stride, padding, output_padding
    w_flip_oihw = jnp.flip(weight, (2, 3)).transpose(1, 0, 2, 3)
    conv = lax.conv_general_dilated(
        x, w_flip_oihw, window_strides=(1, 1),
        padding=[(kH - 1 - p, kH - 1 - p + op), (kW - 1 - p, kW - 1 - p + op)],
        lhs_dilation=(s, s),
        dimension_numbers=('NCHW', 'OIHW', 'NCHW'),
        precision=lax.Precision.HIGHEST)
    out = conv + bias[None, :, None, None]
    return jnp.clip(out, 0.0, 6.0)


if __name__ == "__main__":
    # ConvTranspose2d(4, 8, kernel_size=3, stride=2, padding=1, output_padding=1)
    # fused with ReLU6.
    N, Cin, Cout = 2, 4, 8
    H = W = 8
    kH = kW = 3
    stride, padding, output_padding = 2, 1, 1
    OH = (H - 1) * stride - 2 * padding + kH + output_padding   # 16
    OW = (W - 1) * stride - 2 * padding + kW + output_padding   # 16

    key = jax.random.PRNGKey(0)
    k1, k2, k3 = jax.random.split(key, 3)
    x = jax.random.normal(k1, (N, Cin, H, W), jnp.float32)
    weight = jax.random.normal(k2, (Cin, Cout, kH, kW), jnp.float32) * 0.1
    bias = jax.random.normal(k3, (Cout,), jnp.float32) * 0.1

    plan = make_plan(Cin, Cout, H, W, kH, kW, stride, padding, output_padding)
    w_packed, b_row = pack_weights(weight, bias, plan)   # once, cached in prod
    w_packed, b_row = jax.block_until_ready((w_packed, b_row))

    out = conv_transpose_relu6_2d(x, w_packed, b_row, plan)
    out = jax.block_until_ready(out)

    ref = _reference(x, weight, bias, stride=stride, padding=padding,
                     output_padding=output_padding)
    assert out.shape == (N, Cout, OH, OW), out.shape
    max_err = float(jnp.max(jnp.abs(out - ref)))
    assert jnp.allclose(out, ref, rtol=1e-3, atol=2e-3), max_err

    print("KERNEL_OK")
</pallas_src>

<mosaic_0001>
module attributes {stable_mosaic.version = 11 : i64} {
  func.func @_deconv_relu6_kernel(%arg0: i32, %arg1: memref<8x128xbf16, #tpu.memory_space<vmem>>, %arg2: memref<128x256xbf16, #tpu.memory_space<vmem>>, %arg3: memref<1x256xf32, #tpu.memory_space<vmem>>, %arg4: memref<8x256xf32, #tpu.memory_space<vmem>>) attributes {dimension_semantics = [#tpu.dimension_semantics<parallel>], iteration_bounds = array<i64: 2>, scalar_prefetch = 0 : i64, scratch_operands = 0 : i64, tpu.core_type = #tpu.core_type<tc>, window_params = [{transform_indices = @transform_0, window_bounds = array<i64: 8, 128>}, {pipeline_mode = #tpu.pipeline_mode<synchronous>, transform_indices = @transform_1, window_bounds = array<i64: 128, 256>}, {pipeline_mode = #tpu.pipeline_mode<synchronous>, transform_indices = @transform_2, window_bounds = array<i64: 1, 256>}, {transform_indices = @transform_3, window_bounds = array<i64: 8, 256>}]} {
    %c0 = arith.constant 0 : index
    %c0_0 = arith.constant 0 : index
    %0 = vector.load %arg1[%c0, %c0_0] : memref<8x128xbf16, #tpu.memory_space<vmem>>, vector<8x128xbf16>
    %c0_1 = arith.constant 0 : index
    %c0_2 = arith.constant 0 : index
    %1 = vector.load %arg2[%c0_1, %c0_2] : memref<128x256xbf16, #tpu.memory_space<vmem>>, vector<128x256xbf16>
    %cst = arith.constant dense<0.000000e+00> : vector<8x256xf32>
    %2 = tpu.matmul %0, %1, %cst {dimension_numbers = #tpu.dot_dimension_numbers<[1], [0], [0], [1], [0, 0, 1, 1], [], []>} : vector<8x128xbf16>, vector<128x256xbf16>, vector<8x256xf32> -> vector<8x256xf32>
    %c0_3 = arith.constant 0 : index
    %c0_4 = arith.constant 0 : index
    %3 = vector.load %arg3[%c0_3, %c0_4] : memref<1x256xf32, #tpu.memory_space<vmem>>, vector<1x256xf32>
    %4 = vector.broadcast %3 : vector<1x256xf32> to vector<8x256xf32>
    %5 = arith.addf %2, %4 : vector<8x256xf32>
    %cst_5 = arith.constant 0.000000e+00 : f32
    %cst_6 = arith.constant 6.000000e+00 : f32
    %6 = vector.broadcast %cst_5 : f32 to vector<8x256xf32>
    %7 = arith.maximumf %6, %5 : vector<8x256xf32>
    %8 = vector.broadcast %cst_6 : f32 to vector<8x256xf32>
    %9 = arith.minimumf %8, %7 : vector<8x256xf32>
    %c0_7 = arith.constant 0 : index
    %c0_8 = arith.constant 0 : index
    %10 = vector.load %arg4[%c0_7, %c0_8] : memref<8x256xf32, #tpu.memory_space<vmem>>, vector<8x256xf32>
    tpu.vector_store %arg4[%c0_7, %c0_8], %9 {strides = array<i32>} : memref<8x256xf32, #tpu.memory_space<vmem>>, vector<8x256xf32>,
    return
  }
  func.func @transform_0(%arg0: i32) -> (i32, i32) {
    %c0_i32 = arith.constant 0 : i32
    %c0_i32_0 = arith.constant 0 : i32
    return %arg0, %c0_i32 : i32, i32
  }
  func.func @transform_1(%arg0: i32) -> (i32, i32) {
    %c0_i32 = arith.constant 0 : i32
    %c0_i32_0 = arith.constant 0 : i32
    %c0_i32_1 = arith.constant 0 : i32
    return %c0_i32, %c0_i32_0 : i32, i32
  }
  func.func @transform_2(%arg0: i32) -> (i32, i32) {
    %c0_i32 = arith.constant 0 : i32
    %c0_i32_0 = arith.constant 0 : i32
    %c0_i32_1 = arith.constant 0 : i32
    return %c0_i32, %c0_i32_0 : i32, i32
  }
  func.func @transform_3(%arg0: i32) -> (i32, i32) {
    %c0_i32 = arith.constant 0 : i32
    %c0_i32_0 = arith.constant 0 : i32
    return %arg0, %c0_i32 : i32, i32
  }
}

</mosaic_0001>

<bundles_post_ra>
// kernel: tpu_custom_call.1
= control target key start
LH: loop header
LB: loop body
LE: loop exit
PB: predicated region body
PF: predicated region fallthrough
CT: control target
= control target key end

     0   :  { %8 = vsyncpa [#allocation3], 0  ;;  %s928_s0 = inlined_call_operand.hbm [shape: bf16[16,128], index: 0, kind: input, shape index: {}]   ;;  %s929_s1 = inlined_call_operand.hbm [shape: bf16[128,256], index: 1, kind: input, shape index: {}]   ;;  %s930_s2 = inlined_call_operand.vmem [shape: f32[1,256], index: 2, kind: input, shape index: {}]   ;;  %s931_s3 = inlined_call_operand.hbm [shape: f32[16,256], index: 3, kind: output, shape index: {}]  }
   0x1   :  { %10 = vsyncpa [#allocation3 + $0x1], 0 }
   0x2   :  { %11 = vsyncpa [#allocation6], 0 }
   0x3   :  { %12 = vsyncpa [#allocation4], 0 }
   0x4   :  { %14 = vsyncpa [#allocation4 + $0x1], 0  ;;  %s725_s12 = smov 0   ;;  %s727_s13 = smov 0  }
   0x5   :  { %s729_s14 = smov 0   ;;  %s731_s15 = smov 0  }
   0x6 LB: > { %s746_s16 = sadd.s32 4294967295, %s697_s15   ;;  %s453_s17 = sadd.s32 4294967294, %s697_s15   ;;  %s697_s15 = sphi %s731_s15, %s951_s15   ;;  %s693_s14 = sphi %s729_s14, %s950_s14   ;;  %s689_s13 = sphi %s727_s13, %s949_s13   ;;  %s685_s12 = sphi %s725_s12, %s948_s12  }
   0x7   : > { %p40_p0 = scmp.ne.s32.totalorder %s689_s13, %s685_s12  ;;  %p932_p1 = scmp.eq.s32.totalorder %s746_s16, 0 }
   0x8   : > { %p112_p3 = scmp.eq.s32.totalorder %s453_s17, 1  ;;  %p454_p5 = scmp.ge.s32.totalorder %s697_s15, 1 }
   0x9   : > { %p755_p4 = por %p932_p1, %p40_p0  ;;  %p119_p7 = scmp.lt.s32.totalorder %s697_s15, 3 }
   0xa   : > { %p760_p6 = por %p112_p3, %p40_p0  ;;  %s699_s21 = smov [#allocation5]  }
   0xb   : > { %s935_s18 = scalar_select %p755_p4, 1, 0 }
   0xc   : > { %s936_s19 = scalar_select %p760_p6, 1, 0 }
   0xd   : > { %p765_p8 = pnand %p454_p5, %p119_p7  ;;  %s131_s22 = sshll.u32 %s699_s21, 4  ;;  %s769_s22 = int_to_ptr.vmem [resolvable:$true] %s131_s22 }
   0xe   : > { %s781_s24 = sadd.s32 1, %s697_s15   ;;  %s27_s25 = sadd.s32 1, %s693_s14 }
   0xf   : > { %s937_s20 = scalar_select %p765_p8, 1, 0 }
  0x10   : > { %p493_p9 = pneg %p765_p8  ;;  %s24_s26 = ssub.s32 %s697_s15, %s781_s24 }
  0x11   : > { %s569_s29 = scalar_lea.hbm %s929_s1, 2048 }
  0x12   : > { %p776_p11 = pnand %p493_p9, %p932_p1  ;;  %p570_p12 = scmp.ne.s32.totalorder %s929_s1, %s569_s29 }
  0x13   : > { %p576_p5 = scmp.lt.u32.totalorder %s569_s29, %s929_s1 }
  0x14   : > { %p571_p13 = pneg %p776_p11 }
  0x16   : > { %p572_p0 = pnand %p571_p13, %p570_p12 }
  0x18   : > { %p573_p3 = pneg %p572_p0 }
  0x1a   : > { %p578_p7 = pnand %p576_p5, %p573_p3 }
  0x1c   : > { %581 = shalt.err (!%p578_p7)
}
  0x1d   : > { %s582_s7 = scalar_lea.vmem %s769_s22, 2048  ;;  %p590_p2 = scmp.lt.s32.totalorder %s769_s22, %s769_s22 }
  0x1e   : > { %p583_p9 = scmp.ne.s32.totalorder %s769_s22, %s582_s7  ;;  %p591_p6 = scmp.lt.s32.totalorder %s582_s7, %s582_s7 }
  0x20   : > { %p585_p10 = pnand %p583_p9, %p571_p13  ;;  %p592_p4 = por %p591_p6, %p590_p2 }
  0x22   : > { %p586_p1 = pneg %p585_p10 }
  0x24   : > { %p593_p8 = pnand %p592_p4, %p586_p1 }
  0x26   : > { %596 = shalt.err (!%p593_p8)
}
  0x27   : > { %s700_s8 = smov 128   ;;  %s701_s9 = smov 8  }
  0x28   : > { %496 = dma.hbm_to_vmem [thread:$0]  (!%p776_p11), %s929_s1, 2048, %s769_s22, [#allocation6], %s700_s8, %s700_s8, %s701_s9  }
  0x29   : > { %p25_p2 = scmp.eq.s32.totalorder %s24_s26, 0  ;;  %p34_p1 = scmp.ne.s32.totalorder %s693_s14, %s689_s13 }
  0x2a   : > { %p35_p4 = scmp.eq.s32.totalorder %s697_s15, 0  ;;  %p506_p6 = scmp.lt.s32.totalorder %s697_s15, 2 }
  0x2b   : > { %s812_s17 = scalar_select %p25_p2, %s693_s14, %s27_s25  }
  0x2c   : > { %p36_p8 = por %p35_p4, %p34_p1  ;;  %p939_p10 = scmp.eq.s32.totalorder %s746_s16, 1 }
  0x2d   : > { %s148_s27 = sand.u32 1, %s693_s14   ;;  %s458_s28 = sshll.u32 %s697_s15, 6 }
  0x2e   : > { %p816_p12 = por %p939_p10, %p34_p1  ;;  %s457_s29 = sshll.u32 %s148_s27, 2 }
  0x2f   : > { %s825_s4 = scalar_lea.hbm %s928_s0, %s458_s28  ;;  %s152_s22 = scalar_lea.vmem [#allocation2], %s457_s29 }
  0x30   : > { %s159_s25 = sshll.u32 %s152_s22, 4  ;;  %p827_p11 = pnand %p506_p6, %p36_p8  ;;  %s831_s25 = int_to_ptr.vmem [resolvable:$true] %s159_s25 }
  0x31   : > { %s149_s5 = scalar_lea.sflag [#allocation3], %s148_s27  ;;  %s597_s6 = scalar_lea.hbm %s825_s4, 64 }
  0x32   : > { %p598_p13 = scmp.ne.s32.totalorder %s825_s4, %s597_s6  ;;  %p599_p0 = pneg %p827_p11 }
  0x33   : > { %s602_s9 = scalar_lea.hbm %s928_s0, 128  ;;  %p603_p7 = scmp.lt.u32.totalorder %s825_s4, %s928_s0 }
  0x34   : > { %p600_p3 = pnand %p599_p0, %p598_p13  ;;  %p604_p9 = scmp.lt.u32.totalorder %s602_s9, %s597_s6 }
  0x35   : > { %p606_p1 = scmp.lt.u32.totalorder %s597_s6, %s825_s4 }
  0x36   : > { %p601_p5 = pneg %p600_p3  ;;  %p605_p2 = por %p604_p9, %p603_p7 }
  0x38   : > { %p607_p4 = por %p606_p1, %p605_p2 }
  0x3a   : > { %p608_p6 = pnand %p607_p4, %p601_p5 }
  0x3c   : > { %611 = shalt.err (!%p608_p6)
}
  0x3d   : > { %s612_s27 = scalar_lea.vmem %s831_s25, 64  ;;  %s702_s28 = smov [#allocation2]  }
  0x3e   : > { %p613_p8 = scmp.ne.s32.totalorder %s831_s25, %s612_s27  ;;  %s617_s29 = sshll.u32 %s702_s28, 4  ;;  %s618_s29 = int_to_ptr.vmem [resolvable:$false] %s617_s29 }
  0x3f   : > { %s619_s23 = scalar_lea.vmem %s618_s29, 128  ;;  %p620_p3 = scmp.lt.s32.totalorder %s831_s25, %s618_s29 }
  0x40   : > { %p615_p10 = pnand %p613_p8, %p599_p0  ;;  %p621_p7 = scmp.lt.s32.totalorder %s619_s23, %s612_s27 }
  0x42   : > { %p616_p13 = pneg %p615_p10  ;;  %p622_p9 = por %p621_p7, %p620_p3 }
  0x44   : > { %p623_p2 = pnand %p622_p9, %p616_p13 }
  0x46   : > { %626 = shalt.err (!%p623_p2)
}
  0x47   : > { %500 = dma.hbm_to_vmem [thread:$0]  (!%p827_p11), %s825_s4, 64, %s831_s25, %s149_s5  }
  0x48   : > { %p942_p5 = scmp.ne.s32.totalorder %s937_s20, 0 }
  0x49   : > { %s861_s30 = sand.u32 (!%p942_p5), 1, %s689_s13   ;;  %p943_p0 = scmp.ne.s32.totalorder (!%p942_p5), %s935_s18, 0 }
  0x4a   : > { %168 = sbr.rel (%p942_p5) target bundleno = 351 (0x15f), region = 32  ;;  %s460_s22 = sshll.u32 (!%p942_p5), %s861_s30, 2 }
  0x4b   : > { %s171_s6 = scalar_lea.sflag (!%p942_p5), [#allocation3], %s861_s30  ;;  %s865_s7 = scalar_lea.vmem (!%p942_p5), [#allocation2], %s460_s22 }
  0x51   : > { %672 = dma.done.wait (%p943_p0), %s171_s6, 64  }
  0x52   : > { %674 = vsyncadd (%p943_p0), %s171_s6, 4294967232  ;;  %p944_p11 = scmp.eq.s32.totalorder %s746_s16, 0 }
  0x54   : > { %676 = dma.done.wait (%p944_p11), [#allocation6], 2048   ;;  %p945_p1 = pmov %p944_p11 }
  0x55   : > { %v703_v0 = vmov 0   ;;  %v545_v1 = vld [vmem:[#allocation5 + $0x4] ss:$8 sps:$4 sm:$0xff]   ;;  %v547_v2 = vld [vmem:[#allocation5] ss:$8 sps:$4 sm:$0xff]   ;;  %v221_v18 = vlaneseq  ;;  %s462_s4 = sshll.u32 %s861_s30, 4 }
  0x56   : > { %678 = vsyncadd (%p945_p1), [#allocation6], 4294965248  ;;  %343 = vmatprep.mubr.bf16.mxu0 %v703_v0  ;;  %311 = vmatprep.subr.bf16.mxu0 %v545_v1  ;;  %v548_v3 = vld [vmem:[#allocation5 + $0x14] ss:$8 sps:$4 sm:$0xff]   ;;  %v550_v4 = vld [vmem:[#allocation5 + $0x10] ss:$8 sps:$4 sm:$0xff]  }
  0x57   : > { %312 = vmatpush1.bf16.msra.mxu0 %v547_v2  ;;  %v551_v5 = vld [vmem:[#allocation5 + $0x24] ss:$8 sps:$4 sm:$0xff]   ;;  %v553_v6 = vld [vmem:[#allocation5 + $0x20] ss:$8 sps:$4 sm:$0xff]   ;;  %v554_v7 = vld [vmem:[#allocation5 + $0x34] ss:$8 sps:$4 sm:$0xff]  }
  0x58   : > { %313 = vmatprep.subr.bf16.mxu0 %v548_v3  ;;  %v556_v8 = vld [vmem:[#allocation5 + $0x30] ss:$8 sps:$4 sm:$0xff]   ;;  %v557_v9 = vld [vmem:[#allocation5 + $0x44] ss:$8 sps:$4 sm:$0xff]   ;;  %v559_v10 = vld [vmem:[#allocation5 + $0x40] ss:$8 sps:$4 sm:$0xff]  }
  0x59   : > { %v560_v11 = vld [vmem:[#allocation5 + $0x54] ss:$8 sps:$4 sm:$0xff]   ;;  %v562_v12 = vld [vmem:[#allocation5 + $0x50] ss:$8 sps:$4 sm:$0xff]   ;;  %v563_v13 = vld [vmem:[#allocation5 + $0x64] ss:$8 sps:$4 sm:$0xff]  }
  0x5a   : > { %v565_v14 = vld [vmem:[#allocation5 + $0x60] ss:$8 sps:$4 sm:$0xff]   ;;  %v566_v15 = vld [vmem:[#allocation5 + $0x74] ss:$8 sps:$4 sm:$0xff]   ;;  %v568_v16 = vld [vmem:[#allocation5 + $0x70] ss:$8 sps:$4 sm:$0xff]  }
  0x5b   : > { %314 = vmatpush1.bf16.msra.mxu0 %v550_v4  ;;  %v202_v17 = vld [vmem:[%s865_s7] sm:$0xf]  ;;  %v222_v19 = vshrl.u32 %v221_v18, 7  ;;  %s484_s25 = sshll.u32 %s746_s16, 8  ;;  %s200_s26 = scalar_lea.vmem [#allocation7], %s462_s4 }
  0x5c   : > { %315 = vmatprep.subr.bf16.mxu0 %v551_v5  ;;  %v219_v21 = vld [vmem:[%s930_s2] sm:$0x3]  ;;  %s373_s5 = sshll.u32 %s200_s26, 4  ;;  %s884_s10 = scalar_lea.hbm %s931_s3, %s484_s25  ;;  %s886_s5 = int_to_ptr.vmem [resolvable:$true] %s373_s5 }
  0x5d   : > { %v223_v20 = vsub.s32 0, %v222_v19  ;;  %v227_v22 = vsub.s32 1, %v222_v19  ;;  %s359_s11 = scalar_lea.sflag [#allocation4], %s861_s30  ;;  %s627_s27 = scalar_lea.vmem %s886_s5, 256 }
  0x5e   : > { %p628_p4 = scmp.ne.s32.totalorder %s886_s5, %s627_s27  ;;  %s704_s16 = smov [#allocation7]  }
  0x5f   : > { %316 = vmatpush1.bf16.msra.mxu0 %v553_v6  ;;  %v224_v23 = vrot.slane %v219_v21, %v223_v20  ;;  %v228_v24 = vrot.slane %v219_v21, %v227_v22  ;;  %s631_s28 = sshll.u32 %s704_s16, 4  ;;  %s632_s28 = int_to_ptr.vmem [resolvable:$false] %s631_s28 }
  0x60   : > { %317 = vmatprep.subr.bf16.mxu0 %v554_v7  ;;  %p629_p6 = pnand %p628_p4, %p816_p12  ;;  %s633_s29 = scalar_lea.vmem %s632_s28, 512 }
  0x61   : > { %p634_p10 = scmp.lt.s32.totalorder %s886_s5, %s632_s28  ;;  %p635_p13 = scmp.lt.s32.totalorder %s633_s29, %s627_s27 }
  0x62   : > { %p630_p8 = pneg %p629_p6 }
  0x63   : > { %318 = vmatpush1.bf16.msra.mxu0 %v556_v8  ;;  %p636_p3 = por %p635_p13, %p634_p10 }
  0x64   : > { %319 = vmatprep.subr.bf16.mxu0 %v557_v9 }
  0x65   : > { %p637_p7 = pnand %p636_p3, %p630_p8 }
  0x67   : > { %320 = vmatpush1.bf16.msra.mxu0 %v559_v10 }
  0x68   : > { %321 = vmatprep.subr.bf16.mxu0 %v560_v11 }
  0x6b   : > { %322 = vmatpush1.bf16.msra.mxu0 %v562_v12 }
  0x6c   : > { %323 = vmatprep.subr.bf16.mxu0 %v563_v13 }
  0x6f   : > { %324 = vmatpush1.bf16.msra.mxu0 %v565_v14 }
  0x70   : > { %325 = vmatprep.subr.bf16.mxu0 %v566_v15 }
  0x73   : > { %326 = vmatpush1.bf16.msra.mxu0 %v568_v16 }
  0x76   : > { %344 = vmatmul.mubr.bf16.vlgmr.msra.gmra.mrb[0].mxu0 %v202_v17 }
 0x149   : > { %v345_v25 = vpop.f32.mrb[0].mxu0 }
 0x14a   : > { %v346_v26 = vadd.f32 %v345_v25, %v224_v23  ;;  %v347_v27 = vpop.f32.mrb[1].mxu0 }
 0x14b   : > { %v348_v28 = vadd.f32 %v347_v27, %v228_v24  ;;  %v349_v29 = vpop.f32.mrb[2].mxu0 }
 0x14c   : > { %v352_v30 = vmax.f32 %v346_v26, 0.0  ;;  %v350_v31 = vpop.f32.mrb[3].mxu0 }
 0x14d   : > { %v353_v32 = vmax.f32 %v348_v28, 0.0 }
 0x14e   : > { %v354_v33 = vmin.f32 %v352_v30, 6.0 }
 0x14f   : > { %v355_v34 = vmin.f32 %v353_v32, 6.0 }
 0x150   : > { %356 = vst [vmem:[%s200_s26] sm:$0xff] %v354_v33 }
 0x151   : > { %357 = vst [vmem:[%s200_s26 + $0x8] sm:$0xff] %v355_v34 }
 0x152   : > { %640 = shalt.err (!%p637_p7)
}
 0x153   : > { %s641_s23 = scalar_lea.hbm %s884_s10, 256  ;;  %s645_s6 = scalar_lea.hbm %s931_s3, 512 }
 0x154   : > { %p642_p9 = scmp.ne.s32.totalorder %s884_s10, %s641_s23  ;;  %p646_p0 = scmp.lt.u32.totalorder %s884_s10, %s931_s3 }
 0x155   : > { %p647_p11 = scmp.lt.u32.totalorder %s645_s6, %s641_s23  ;;  %p649_p4 = scmp.lt.u32.totalorder %s641_s23, %s884_s10 }
 0x156   : > { %p643_p2 = pnand %p642_p9, %p816_p12 }
 0x157   : > { %p648_p1 = por %p647_p11, %p646_p0 }
 0x158   : > { %p644_p5 = pneg %p643_p2 }
 0x159   : > { %p650_p6 = por %p649_p4, %p648_p1 }
 0x15b   : > { %p651_p8 = pnand %p650_p6, %p644_p5 }
 0x15d   : > { %654 = shalt.err (!%p651_p8)
}
 0x15e   : > { %491 = dma.vmem_to_hbm [thread:$0]  (%p816_p12), %s886_s5, 256, %s884_s10, %s359_s11  }
 0x15f PF: > { %s385_s20 = sand.u32 1, %s685_s12   ;;  %p946_p10 = scmp.ne.s32.totalorder %s936_s19, 0 }
 0x160   : > { %p947_p13 = scmp.ge.s32.totalorder %s697_s15, 2  ;;  %s386_s4 = scalar_lea.sflag [#allocation4], %s385_s20 }
 0x162   : > { %p502_p3 = pnand %p947_p13, %p946_p10 }
 0x164   : > { %680 = dma.done.wait (!%p502_p3), %s386_s4, 256  }
 0x165   : > { %682 = vsyncadd (!%p502_p3), %s386_s4, 4294967040  ;;  %p17_p7 = scmp.ge.s32.totalorder %s781_s24, 4   ;;  %s948_s12 = smov %s689_s13 }
 0x166   : > { %s949_s13 = smov %s693_s14  ;;  %s950_s14 = smov %s812_s17 }
 0x167   : > { %s951_s15 = smov %s781_s24  ;;  %19 = sbr.rel (!%p17_p7) target bundleno = 6 (0x6), region = 81 }
 0x16e   :  { %391 = vsyncpa [#allocation3], 1 }
 0x16f   :  { %393 = vsyncpa [#allocation3 + $0x1], 1 }
 0x170   :  { %394 = vsyncpa [#allocation6], 1 }
 0x171   :  { %395 = vsyncpa [#allocation4], 1 }
 0x172   :  { %397 = vsyncpa [#allocation4 + $0x1], 1 }

</bundles_post_ra>
